<compile_context>
chip_gen: v7x
topology: tpu7x:2x2x1
jax: 0.10.0
libtpu: 0.0.40
codegen_flags: <defaults>
</compile_context>

<pallas_src>
import functools
import math

import jax
import jax.numpy as jnp
from jax.experimental import pallas as pl
from jax.experimental.pallas import tpu as pltpu


def _round_up(n, m):
    return ((n + m - 1) // m) * m


def memory_module_kernel(
    x_ref,        # (TB, F)   batch tile of flattened inputs
    w1_ref,       # (F, F)    controller linear 1, (in, out)
    b1_ref,       # (1, F)
    w2_ref,       # (F, F)    controller linear 2, (in, out)
    b2_ref,       # (1, F)
    keys_t_ref,   # (F, Mp)   memory_keys, transposed + lane-padded
    mem_ref,      # (Mp, F)   memory (padded rows are zero)
    wg_ref,       # (2F, F)   fused gate weight, (in, out)
    bg_ref,       # (1, F)
    out_ref,      # (TB, F)
    attn_ref,     # (TB, Mp)
    new_mem_ref,  # (Mp, F)
    mem_upd_ref,  # VMEM scratch (Mp, F) f32: running sum of mask.T @ x over tiles
    *,
    m_actual: int,
    inv_sqrt_f: float,
):
    i = pl.program_id(0)

    @pl.when(i == 0)
    def _():
        mem_upd_ref[...] = jnp.zeros_like(mem_upd_ref)

    x = x_ref[...].astype(jnp.float32)

    # controller: Linear -> ReLU -> Linear
    h = jnp.dot(x, w1_ref[...], preferred_element_type=jnp.float32) + b1_ref[...]
    h = jnp.maximum(h, 0.0)
    query = jnp.dot(h, w2_ref[...], preferred_element_type=jnp.float32) + b2_ref[...]

    # attention = softmax(query @ memory_keys.T / sqrt(F)) over the (padded) memory axis
    scores = jnp.dot(query, keys_t_ref[...], preferred_element_type=jnp.float32)
    scores = scores * inv_sqrt_f
    mp = attn_ref.shape[1]
    if m_actual < mp:  # static condition: mask padded memory slots
        col = jax.lax.broadcasted_iota(jnp.int32, scores.shape, 1)
        scores = jnp.where(col < m_actual, scores, -1e30)
    m = jnp.max(scores, axis=-1, keepdims=True)
    e = jnp.exp(scores - m)
    denom = jnp.sum(e, axis=-1, keepdims=True)
    # >0.1 update mask computed *before* the approximate division so the memory
    # update matches the exact softmax threshold.
    update_mask = (e > 0.1 * denom).astype(jnp.float32)
    attn = e * pl.reciprocal(denom, approx=True)

    # retrieved = attention @ memory  (padded attn columns are exactly 0)
    retrieved = jnp.dot(attn, mem_ref[...], preferred_element_type=jnp.float32)

    # gate = sigmoid([x, retrieved] @ Wg + bg)  -- single fused K=2F MXU pass
    gate_in = jnp.concatenate([x, retrieved], axis=1)
    gate_pre = jnp.dot(gate_in, wg_ref[...], preferred_element_type=jnp.float32) + bg_ref[...]
    gate = pl.reciprocal(1.0 + jnp.exp(-gate_pre), approx=True)

    out_ref[...] = (gate * retrieved + (1.0 - gate) * x).astype(out_ref.dtype)
    attn_ref[...] = attn.astype(attn_ref.dtype)

    # accumulate mask.T @ x over batch tiles (contract over the TB axis)
    mem_upd_ref[...] += jax.lax.dot_general(
        update_mask, x,
        dimension_numbers=(((0,), (0,)), ((), ())),
        preferred_element_type=jnp.float32,
    )

    @pl.when(i == pl.num_programs(0) - 1)
    def _():
        new_mem_ref[...] = (0.99 * mem_ref[...] + 0.01 * mem_upd_ref[...]).astype(
            new_mem_ref.dtype)


def prepare_params(params):
    """One-time layout prep: transpose weights to (in, out), fuse the gate weight,
    and pad memory_size up to a lane-aligned multiple of 128 (padded rows/keys = 0)."""
    F = params["ctrl_w1"].shape[0]
    M = params["memory"].shape[0]
    Mp = _round_up(M, 128)
    pad = Mp - M
    return {
        "feature_dim": F,
        "memory_size": M,
        "memory_padded": Mp,
        "w1": params["ctrl_w1"].T,                                     # (F, F)
        "b1": params["ctrl_b1"].reshape(1, F),
        "w2": params["ctrl_w2"].T,                                     # (F, F)
        "b2": params["ctrl_b2"].reshape(1, F),
        "keys_t": jnp.pad(params["memory_keys"], ((0, pad), (0, 0))).T,  # (F, Mp)
        "memory": jnp.pad(params["memory"], ((0, pad), (0, 0))),        # (Mp, F)
        "wg": params["gate_w"].T,                                       # (2F, F)
        "bg": params["gate_b"].reshape(1, F),
    }


def memory_module_forward(x, prep):
    """x: (B, F) float32, prep: output of prepare_params.

    Returns (output (B, F), attention (B, M), new_memory_padded (Mp, F)).
    The padded new memory is the next-call state (feed it back as prep['memory'])."""
    B, F = x.shape
    M = prep["memory_size"]
    Mp = prep["memory_padded"]

    # Batch tile: fill MXU rows when B is large; pad to a sublane multiple when small.
    TB = 256 if B >= 256 else _round_up(B, 8)
    Bp = _round_up(B, TB)
    xp = x if Bp == B else jnp.pad(x, ((0, Bp - B), (0, 0)))
    grid = (Bp // TB,)

    kernel = functools.partial(
        memory_module_kernel,
        m_actual=M,
        inv_sqrt_f=1.0 / math.sqrt(float(F)),
    )

    const2 = lambda i: (0, 0)
    in_specs = [
        pl.BlockSpec((TB, F), lambda i: (i, 0)),       # x tile
        pl.BlockSpec((F, F), const2),                  # w1 (resident)
        pl.BlockSpec((1, F), const2),                  # b1
        pl.BlockSpec((F, F), const2),                  # w2
        pl.BlockSpec((1, F), const2),                  # b2
        pl.BlockSpec((F, Mp), const2),                 # keys_t
        pl.BlockSpec((Mp, F), const2),                 # memory
        pl.BlockSpec((2 * F, F), const2),              # fused gate weight
        pl.BlockSpec((1, F), const2),                  # bg
    ]
    out_specs = (
        pl.BlockSpec((TB, F), lambda i: (i, 0)),       # output tile
        pl.BlockSpec((TB, Mp), lambda i: (i, 0)),      # attention tile (lane-dense)
        pl.BlockSpec((Mp, F), const2),                 # updated memory (written at last tile)
    )
    out_shapes = (
        jax.ShapeDtypeStruct((Bp, F), x.dtype),
        jax.ShapeDtypeStruct((Bp, Mp), jnp.float32),
        jax.ShapeDtypeStruct((Mp, F), jnp.float32),
    )

    f32 = 4
    est_vmem = f32 * (
        2 * TB * F                                      # x tiles (double buffered)
        + 2 * TB * F                                    # output tiles
        + 2 * TB * Mp                                   # attention tiles
        + 2 * (4 * F * F + F * Mp + Mp * F + 3 * F)     # resident weights / keys / memory
        + 2 * Mp * F                                    # new-memory output
        + Mp * F                                        # accumulator scratch
    )
    vmem_limit = min(64 * 1024 * 1024, max(32 * 1024 * 1024, int(est_vmem * 1.25)))

    out, attn_p, new_mem_p = pl.pallas_call(
        kernel,
        out_shape=out_shapes,
        grid_spec=pltpu.PrefetchScalarGridSpec(
            num_scalar_prefetch=0,
            grid=grid,
            in_specs=in_specs,
            out_specs=out_specs,
            scratch_shapes=[pltpu.VMEM((Mp, F), jnp.float32)],
        ),
        compiler_params=pltpu.CompilerParams(
            dimension_semantics=("arbitrary",),   # memory-update reduction over batch tiles
            vmem_limit_bytes=vmem_limit,
        ),
        input_output_aliases={6: 2},              # update memory in place
    )(xp, prep["w1"], prep["b1"], prep["w2"], prep["b2"],
      prep["keys_t"], prep["memory"], prep["wg"], prep["bg"])

    return out[:B], attn_p[:B, :M], new_mem_p


def init_params(key, feature_dim, memory_size):
    ks = jax.random.split(key, 8)
    F, M = feature_dim, memory_size
    lim_f = 1.0 / math.sqrt(F)
    lim_2f = 1.0 / math.sqrt(2 * F)
    return {
        "memory": jax.random.normal(ks[0], (M, F), jnp.float32),
        "memory_keys": jax.random.normal(ks[1], (M, F), jnp.float32),
        "ctrl_w1": jax.random.uniform(ks[2], (F, F), jnp.float32, -lim_f, lim_f),
        "ctrl_b1": jax.random.uniform(ks[3], (F,), jnp.float32, -lim_f, lim_f),
        "ctrl_w2": jax.random.uniform(ks[4], (F, F), jnp.float32, -lim_f, lim_f),
        "ctrl_b2": jax.random.uniform(ks[5], (F,), jnp.float32, -lim_f, lim_f),
        "gate_w": jax.random.uniform(ks[6], (F, 2 * F), jnp.float32, -lim_2f, lim_2f),
        "gate_b": jax.random.uniform(ks[7], (F,), jnp.float32, -lim_2f, lim_2f),
    }


def reference_forward(x, params):
    """Pure-JAX reference mirroring the PyTorch forward (unpadded layouts)."""
    F = x.shape[1]
    h = jnp.maximum(x @ params["ctrl_w1"].T + params["ctrl_b1"], 0.0)
    query = h @ params["ctrl_w2"].T + params["ctrl_b2"]
    scores = (query @ params["memory_keys"].T) / jnp.sqrt(jnp.float32(F))
    attn = jax.nn.softmax(scores, axis=1)
    retrieved = attn @ params["memory"]
    gate_in = jnp.concatenate([x, retrieved], axis=1)
    gate = jax.nn.sigmoid(gate_in @ params["gate_w"].T + params["gate_b"])
    out = gate * retrieved + (1.0 - gate) * x
    new_mem = 0.99 * params["memory"] + 0.01 * ((attn > 0.1).astype(jnp.float32).T @ x)
    return out, attn, new_mem


if __name__ == "__main__":
    B, F, M = 8, 128, 64  # batch, feature_dim, memory_size
    key = jax.random.PRNGKey(0)
    k_x, k_p = jax.random.split(key)
    x = jax.random.normal(k_x, (B, F), jnp.float32)
    params = init_params(k_p, F, M)

    prep = prepare_params(params)  # one-time layout prep (transposes, fusion, padding)

    out, attn, new_mem_p = memory_module_forward(x, prep)
    jax.block_until_ready((out, attn, new_mem_p))

    out_ref, attn_ref, new_mem_ref = reference_forward(x, params)
    assert out.shape == (B, F) and attn.shape == (B, M) and new_mem_p.shape == (prep["memory_padded"], F)
    # approx reciprocal (EUP) on softmax/sigmoid -> slightly looser tolerances.
    assert jnp.allclose(attn, attn_ref, atol=5e-3, rtol=5e-3), "attention mismatch"
    assert jnp.allclose(out, out_ref, atol=1e-2, rtol=1e-2), "output mismatch"
    assert jnp.allclose(new_mem_p[:M], new_mem_ref, atol=2e-3, rtol=2e-3), "memory mismatch"
    # padded memory rows must stay exactly zero so the padded state can be fed back.
    assert jnp.all(new_mem_p[M:] == 0.0)

    print("KERNEL_OK")
</pallas_src>

<mosaic_0001>
module attributes {stable_mosaic.version = 11 : i64} {
  func.func @memory_module_kernel(%arg0: i32, %arg1: memref<8x128xf32, #tpu.memory_space<vmem>>, %arg2: memref<128x128xf32, #tpu.memory_space<vmem>>, %arg3: memref<1x128xf32, #tpu.memory_space<vmem>>, %arg4: memref<128x128xf32, #tpu.memory_space<vmem>>, %arg5: memref<1x128xf32, #tpu.memory_space<vmem>>, %arg6: memref<128x128xf32, #tpu.memory_space<vmem>>, %arg7: memref<128x128xf32, #tpu.memory_space<vmem>>, %arg8: memref<256x128xf32, #tpu.memory_space<vmem>>, %arg9: memref<1x128xf32, #tpu.memory_space<vmem>>, %arg10: memref<8x128xf32, #tpu.memory_space<vmem>>, %arg11: memref<8x128xf32, #tpu.memory_space<vmem>>, %arg12: memref<128x128xf32, #tpu.memory_space<vmem>>, %arg13: memref<128x128xf32, #tpu.memory_space<vmem>>) attributes {dimension_semantics = [#tpu.dimension_semantics<arbitrary>], iteration_bounds = array<i64: 1>, scalar_prefetch = 0 : i64, scratch_operands = 1 : i64, tpu.core_type = #tpu.core_type<tc>, window_params = [{transform_indices = @transform_0, window_bounds = array<i64: 8, 128>}, {pipeline_mode = #tpu.pipeline_mode<synchronous>, transform_indices = @transform_1, window_bounds = array<i64: 128, 128>}, {pipeline_mode = #tpu.pipeline_mode<synchronous>, transform_indices = @transform_2, window_bounds = array<i64: 1, 128>}, {pipeline_mode = #tpu.pipeline_mode<synchronous>, transform_indices = @transform_3, window_bounds = array<i64: 128, 128>}, {pipeline_mode = #tpu.pipeline_mode<synchronous>, transform_indices = @transform_4, window_bounds = array<i64: 1, 128>}, {pipeline_mode = #tpu.pipeline_mode<synchronous>, transform_indices = @transform_5, window_bounds = array<i64: 128, 128>}, {pipeline_mode = #tpu.pipeline_mode<synchronous>, transform_indices = @transform_6, window_bounds = array<i64: 128, 128>}, {pipeline_mode = #tpu.pipeline_mode<synchronous>, transform_indices = @transform_7, window_bounds = array<i64: 256, 128>}, {pipeline_mode = #tpu.pipeline_mode<synchronous>, transform_indices = @transform_8, window_bounds = array<i64: 1, 128>}, {transform_indices = @transform_9, window_bounds = array<i64: 8, 128>}, {transform_indices = @transform_10, window_bounds = array<i64: 8, 128>}, {pipeline_mode = #tpu.pipeline_mode<synchronous>, transform_indices = @transform_11, window_bounds = array<i64: 128, 128>}]} {
    %c0_i32 = arith.constant 0 : i32
    %0 = arith.cmpi eq, %arg0, %c0_i32 : i32
    %1 = arith.extui %0 : i1 to i32
    %c0_i32_0 = arith.constant 0 : i32
    %2 = arith.cmpi ne, %1, %c0_i32_0 : i32
    scf.if %2 {
      %cst_42 = arith.constant 0.000000e+00 : f32
      %69 = vector.broadcast %cst_42 : f32 to vector<128x128xf32>
      %c0_43 = arith.constant 0 : index
      %c0_44 = arith.constant 0 : index
      %70 = vector.load %arg13[%c0_43, %c0_44] : memref<128x128xf32, #tpu.memory_space<vmem>>, vector<128x128xf32>
      tpu.vector_store %arg13[%c0_43, %c0_44], %69 {strides = array<i32>} : memref<128x128xf32, #tpu.memory_space<vmem>>, vector<128x128xf32>,
    } else {
    }
    %c0 = arith.constant 0 : index
    %c0_1 = arith.constant 0 : index
    %3 = vector.load %arg1[%c0, %c0_1] : memref<8x128xf32, #tpu.memory_space<vmem>>, vector<8x128xf32>
    %c0_2 = arith.constant 0 : index
    %c0_3 = arith.constant 0 : index
    %4 = vector.load %arg2[%c0_2, %c0_3] : memref<128x128xf32, #tpu.memory_space<vmem>>, vector<128x128xf32>
    %cst = arith.constant dense<0.000000e+00> : vector<8x128xf32>
    %5 = tpu.matmul %3, %4, %cst {dimension_numbers = #tpu.dot_dimension_numbers<[1], [0], [0], [1], [0, 0, 1, 1], [], []>} : vector<8x128xf32>, vector<128x128xf32>, vector<8x128xf32> -> vector<8x128xf32>
    %c0_4 = arith.constant 0 : index
    %c0_5 = arith.constant 0 : index
    %6 = vector.load %arg3[%c0_4, %c0_5] : memref<1x128xf32, #tpu.memory_space<vmem>>, vector<1x128xf32>
    %7 = vector.broadcast %6 : vector<1x128xf32> to vector<8x128xf32>
    %8 = arith.addf %5, %7 : vector<8x128xf32>
    %cst_6 = arith.constant 0.000000e+00 : f32
    %9 = vector.broadcast %cst_6 : f32 to vector<8x128xf32>
    %10 = arith.maximumf %8, %9 : vector<8x128xf32>
    %c0_7 = arith.constant 0 : index
    %c0_8 = arith.constant 0 : index
    %11 = vector.load %arg4[%c0_7, %c0_8] : memref<128x128xf32, #tpu.memory_space<vmem>>, vector<128x128xf32>
    %cst_9 = arith.constant dense<0.000000e+00> : vector<8x128xf32>
    %12 = tpu.matmul %10, %11, %cst_9 {dimension_numbers = #tpu.dot_dimension_numbers<[1], [0], [0], [1], [0, 0, 1, 1], [], []>} : vector<8x128xf32>, vector<128x128xf32>, vector<8x128xf32> -> vector<8x128xf32>
    %c0_10 = arith.constant 0 : index
    %c0_11 = arith.constant 0 : index
    %13 = vector.load %arg5[%c0_10, %c0_11] : memref<1x128xf32, #tpu.memory_space<vmem>>, vector<1x128xf32>
    %14 = vector.broadcast %13 : vector<1x128xf32> to vector<8x128xf32>
    %15 = arith.addf %12, %14 : vector<8x128xf32>
    %c0_12 = arith.constant 0 : index
    %c0_13 = arith.constant 0 : index
    %16 = vector.load %arg6[%c0_12, %c0_13] : memref<128x128xf32, #tpu.memory_space<vmem>>, vector<128x128xf32>
    %cst_14 = arith.constant dense<0.000000e+00> : vector<8x128xf32>
    %17 = tpu.matmul %15, %16, %cst_14 {dimension_numbers = #tpu.dot_dimension_numbers<[1], [0], [0], [1], [0, 0, 1, 1], [], []>} : vector<8x128xf32>, vector<128x128xf32>, vector<8x128xf32> -> vector<8x128xf32>
    %cst_15 = arith.constant 0.0883883461 : f32
    %18 = vector.broadcast %cst_15 : f32 to vector<8x128xf32>
    %19 = arith.mulf %17, %18 : vector<8x128xf32>
    %20 = tpu.iota {dimensions = array<i32: 1>} : vector<8x128xi32>
    %c64_i32 = arith.constant 64 : i32
    %21 = vector.broadcast %c64_i32 : i32 to vector<8x128xi32>
    %22 = arith.cmpi slt, %20, %21 : vector<8x128xi32>
    %cst_16 = arith.constant -1.000000e+30 : f32
    %23 = vector.broadcast %cst_16 : f32 to vector<8x128xf32>
    %24 = arith.select %22, %19, %23 : vector<8x128xi1>, vector<8x128xf32>
    %cst_17 = arith.constant dense<0xFF800000> : vector<8xf32>
    %25 = vector.multi_reduction <maximumf>, %24, %cst_17 [1] : vector<8x128xf32> to vector<8xf32>
    %26 = vector.shape_cast %25 : vector<8xf32> to vector<8x1xf32>
    %27 = vector.broadcast %26 : vector<8x1xf32> to vector<8x128xf32>
    %28 = arith.subf %24, %27 : vector<8x128xf32>
    %29 = math.exp %28 : vector<8x128xf32>
    %cst_18 = arith.constant dense<0.000000e+00> : vector<8xf32>
    %30 = vector.multi_reduction <add>, %29, %cst_18 [1] : vector<8x128xf32> to vector<8xf32>
    %31 = vector.shape_cast %30 : vector<8xf32> to vector<8x1xf32>
    %cst_19 = arith.constant 1.000000e-01 : f32
    %32 = vector.broadcast %cst_19 : f32 to vector<8x1xf32>
    %33 = arith.mulf %32, %31 : vector<8x1xf32>
    %34 = vector.broadcast %33 : vector<8x1xf32> to vector<8x128xf32>
    %35 = arith.cmpf ogt, %29, %34 : vector<8x128xf32>
    %36 = arith.extui %35 : vector<8x128xi1> to vector<8x128xi32>
    %37 = arith.sitofp %36 : vector<8x128xi32> to vector<8x128xf32>
    %38 = tpu.reciprocal %31 {approx = true} : vector<8x1xf32> -> vector<8x1xf32>
    %39 = vector.broadcast %38 : vector<8x1xf32> to vector<8x128xf32>
    %40 = arith.mulf %29, %39 : vector<8x128xf32>
    %c0_20 = arith.constant 0 : index
    %c0_21 = arith.constant 0 : index
    %41 = vector.load %arg7[%c0_20, %c0_21] : memref<128x128xf32, #tpu.memory_space<vmem>>, vector<128x128xf32>
    %cst_22 = arith.constant dense<0.000000e+00> : vector<8x128xf32>
    %42 = tpu.matmul %40, %41, %cst_22 {dimension_numbers = #tpu.dot_dimension_numbers<[1], [0], [0], [1], [0, 0, 1, 1], [], []>} : vector<8x128xf32>, vector<128x128xf32>, vector<8x128xf32> -> vector<8x128xf32>
    %43 = tpu.concatenate %3, %42 in 1 : vector<8x128xf32>, vector<8x128xf32> -> vector<8x256xf32>
    %c0_23 = arith.constant 0 : index
    %c0_24 = arith.constant 0 : index
    %44 = vector.load %arg8[%c0_23, %c0_24] : memref<256x128xf32, #tpu.memory_space<vmem>>, vector<256x128xf32>
    %cst_25 = arith.constant dense<0.000000e+00> : vector<8x128xf32>
    %45 = tpu.matmul %43, %44, %cst_25 {dimension_numbers = #tpu.dot_dimension_numbers<[1], [0], [0], [1], [0, 0, 1, 1], [], []>} : vector<8x256xf32>, vector<256x128xf32>, vector<8x128xf32> -> vector<8x128xf32>
    %c0_26 = arith.constant 0 : index
    %c0_27 = arith.constant 0 : index
    %46 = vector.load %arg9[%c0_26, %c0_27] : memref<1x128xf32, #tpu.memory_space<vmem>>, vector<1x128xf32>
    %47 = vector.broadcast %46 : vector<1x128xf32> to vector<8x128xf32>
    %48 = arith.addf %45, %47 : vector<8x128xf32>
    %cst_28 = arith.constant 0.000000e+00 : f32
    %49 = vector.broadcast %cst_28 : f32 to vector<8x128xf32>
    %50 = arith.subf %49, %48 : vector<8x128xf32>
    %51 = math.exp %50 : vector<8x128xf32>
    %cst_29 = arith.constant 1.000000e+00 : f32
    %52 = vector.broadcast %cst_29 : f32 to vector<8x128xf32>
    %53 = arith.addf %52, %51 : vector<8x128xf32>
    %54 = tpu.reciprocal %53 {approx = true} : vector<8x128xf32> -> vector<8x128xf32>
    %55 = arith.mulf %54, %42 : vector<8x128xf32>
    %cst_30 = arith.constant 1.000000e+00 : f32
    %56 = vector.broadcast %cst_30 : f32 to vector<8x128xf32>
    %57 = arith.subf %56, %54 : vector<8x128xf32>
    %58 = arith.mulf %57, %3 : vector<8x128xf32>
    %59 = arith.addf %55, %58 : vector<8x128xf32>
    %c0_31 = arith.constant 0 : index
    %c0_32 = arith.constant 0 : index
    %60 = vector.load %arg10[%c0_31, %c0_32] : memref<8x128xf32, #tpu.memory_space<vmem>>, vector<8x128xf32>
    tpu.vector_store %arg10[%c0_31, %c0_32], %59 {strides = array<i32>} : memref<8x128xf32, #tpu.memory_space<vmem>>, vector<8x128xf32>,
    %c0_33 = arith.constant 0 : index
    %c0_34 = arith.constant 0 : index
    %61 = vector.load %arg11[%c0_33, %c0_34] : memref<8x128xf32, #tpu.memory_space<vmem>>, vector<8x128xf32>
    tpu.vector_store %arg11[%c0_33, %c0_34], %40 {strides = array<i32>} : memref<8x128xf32, #tpu.memory_space<vmem>>, vector<8x128xf32>,
    %c0_35 = arith.constant 0 : index
    %c0_36 = arith.constant 0 : index
    %62 = vector.load %arg13[%c0_35, %c0_36] : memref<128x128xf32, #tpu.memory_space<vmem>>, vector<128x128xf32>
    %cst_37 = arith.constant dense<0.000000e+00> : vector<128x128xf32>
    %63 = tpu.matmul %37, %3, %cst_37 {dimension_numbers = #tpu.dot_dimension_numbers<[0], [0], [1], [1], [0, 1, 1, 1], [], []>} : vector<8x128xf32>, vector<8x128xf32>, vector<128x128xf32> -> vector<128x128xf32>
    %64 = arith.addf %62, %63 : vector<128x128xf32>
    %c0_38 = arith.constant 0 : index
    %c0_39 = arith.constant 0 : index
    %65 = vector.load %arg13[%c0_38, %c0_39] : memref<128x128xf32, #tpu.memory_space<vmem>>, vector<128x128xf32>
    tpu.vector_store %arg13[%c0_38, %c0_39], %64 {strides = array<i32>} : memref<128x128xf32, #tpu.memory_space<vmem>>, vector<128x128xf32>,
    %c0_i32_40 = arith.constant 0 : i32
    %66 = arith.cmpi eq, %arg0, %c0_i32_40 : i32
    %67 = arith.extui %66 : i1 to i32
    %c0_i32_41 = arith.constant 0 : i32
    %68 = arith.cmpi ne, %67, %c0_i32_41 : i32
    scf.if %68 {
      %c0_42 = arith.constant 0 : index
      %c0_43 = arith.constant 0 : index
      %69 = vector.load %arg7[%c0_42, %c0_43] : memref<128x128xf32, #tpu.memory_space<vmem>>, vector<128x128xf32>
      %cst_44 = arith.constant 9.900000e-01 : f32
      %70 = vector.broadcast %cst_44 : f32 to vector<128x128xf32>
      %71 = arith.mulf %70, %69 : vector<128x128xf32>
      %c0_45 = arith.constant 0 : index
      %c0_46 = arith.constant 0 : index
      %72 = vector.load %arg13[%c0_45, %c0_46] : memref<128x128xf32, #tpu.memory_space<vmem>>, vector<128x128xf32>
      %cst_47 = arith.constant 0.00999999977 : f32
      %73 = vector.broadcast %cst_47 : f32 to vector<128x128xf32>
      %74 = arith.mulf %73, %72 : vector<128x128xf32>
      %75 = arith.addf %71, %74 : vector<128x128xf32>
      %c0_48 = arith.constant 0 : index
      %c0_49 = arith.constant 0 : index
      %76 = vector.load %arg12[%c0_48, %c0_49] : memref<128x128xf32, #tpu.memory_space<vmem>>, vector<128x128xf32>
      tpu.vector_store %arg12[%c0_48, %c0_49], %75 {strides = array<i32>} : memref<128x128xf32, #tpu.memory_space<vmem>>, vector<128x128xf32>,
    } else {
    }
    return
  }
  func.func @transform_0(%arg0: i32) -> (i32, i32) {
    %c0_i32 = arith.constant 0 : i32
    %c0_i32_0 = arith.constant 0 : i32
    return %arg0, %c0_i32 : i32, i32
  }
  func.func @transform_1(%arg0: i32) -> (i32, i32) {
    %c0_i32 = arith.constant 0 : i32
    %c0_i32_0 = arith.constant 0 : i32
    %c0_i32_1 = arith.constant 0 : i32
    return %c0_i32, %c0_i32_0 : i32, i32
  }
  func.func @transform_2(%arg0: i32) -> (i32, i32) {
    %c0_i32 = arith.constant 0 : i32
    %c0_i32_0 = arith.constant 0 : i32
    %c0_i32_1 = arith.constant 0 : i32
    return %c0_i32, %c0_i32_0 : i32, i32
  }
  func.func @transform_3(%arg0: i32) -> (i32, i32) {
    %c0_i32 = arith.constant 0 : i32
    %c0_i32_0 = arith.constant 0 : i32
    %c0_i32_1 = arith.constant 0 : i32
    return %c0_i32, %c0_i32_0 : i32, i32
  }
  func.func @transform_4(%arg0: i32) -> (i32, i32) {
    %c0_i32 = arith.constant 0 : i32
    %c0_i32_0 = arith.constant 0 : i32
    %c0_i32_1 = arith.constant 0 : i32
    return %c0_i32, %c0_i32_0 : i32, i32
  }
  func.func @transform_5(%arg0: i32) -> (i32, i32) {
    %c0_i32 = arith.constant 0 : i32
    %c0_i32_0 = arith.constant 0 : i32
    %c0_i32_1 = arith.constant 0 : i32
    return %c0_i32, %c0_i32_0 : i32, i32
  }
  func.func @transform_6(%arg0: i32) -> (i32, i32) {
    %c0_i32 = arith.constant 0 : i32
    %c0_i32_0 = arith.constant 0 : i32
    %c0_i32_1 = arith.constant 0 : i32
    return %c0_i32, %c0_i32_0 : i32, i32
  }
  func.func @transform_7(%arg0: i32) -> (i32, i32) {
    %c0_i32 = arith.constant 0 : i32
    %c0_i32_0 = arith.constant 0 : i32
    %c0_i32_1 = arith.constant 0 : i32
    return %c0_i32, %c0_i32_0 : i32, i32
  }
  func.func @transform_8(%arg0: i32) -> (i32, i32) {
    %c0_i32 = arith.constant 0 : i32
    %c0_i32_0 = arith.constant 0 : i32
    %c0_i32_1 = arith.constant 0 : i32
    return %c0_i32, %c0_i32_0 : i32, i32
  }
  func.func @transform_9(%arg0: i32) -> (i32, i32) {
    %c0_i32 = arith.constant 0 : i32
    %c0_i32_0 = arith.constant 0 : i32
    return %arg0, %c0_i32 : i32, i32
  }
  func.func @transform_10(%arg0: i32) -> (i32, i32) {
    %c0_i32 = arith.constant 0 : i32
    %c0_i32_0 = arith.constant 0 : i32
    return %arg0, %c0_i32 : i32, i32
  }
  func.func @transform_11(%arg0: i32) -> (i32, i32) {
    %c0_i32 = arith.constant 0 : i32
    %c0_i32_0 = arith.constant 0 : i32
    %c0_i32_1 = arith.constant 0 : i32
    return %c0_i32, %c0_i32_0 : i32, i32
  }
}

</mosaic_0001>

<bundles_post_ra>
// kernel: tpu_custom_call.1
= control target key start
LH: loop header
LB: loop body
LE: loop exit
PB: predicated region body
PF: predicated region fallthrough
CT: control target
= control target key end

     0   :  { %17 = vsyncpa [#allocation4], 0  ;;  %s2072_s0 = inlined_call_operand.vmem [shape: f32[8,128], index: 0, kind: input, shape index: {}]   ;;  %s2073_s1 = inlined_call_operand.hbm [shape: f32[128,128], index: 1, kind: input, shape index: {}]   ;;  %s2074_s2 = inlined_call_operand.vmem [shape: f32[1,128], index: 2, kind: input, shape index: {}]   ;;  %s2075_s3 = inlined_call_operand.hbm [shape: f32[128,128], index: 3, kind: input, shape index: {}]   ;;  %s2076_s4 = inlined_call_operand.vmem [shape: f32[1,128], index: 4, kind: input, shape index: {}]   ;;  %s2077_s5 = inlined_call_operand.hbm [shape: f32[128,128], index: 5, kind: input, shape index: {}]   ;;  %s2078_s6 = inlined_call_operand.hbm [shape: f32[128,128], index: 6, kind: input, shape index: {}, may-alias: {6,11}]   ;;  %s2079_s7 = inlined_call_operand.vmem [shape: f32[256,128], index: 7, kind: input, shape index: {}]   ;;  %s2080_s8 = inlined_call_operand.vmem [shape: f32[1,128], index: 8, kind: input, shape index: {}]   ;;  %s2081_s9 = inlined_call_operand.hbm [shape: f32[8,128], index: 9, kind: output, shape index: {0}]   ;;  %s2082_s10 = inlined_call_operand.hbm [shape: f32[8,128], index: 10, kind: output, shape index: {1}]   ;;  %s2083_s11 = inlined_call_operand.hbm [shape: f32[128,128], index: 11, kind: output, shape index: {2}, may-alias: {6,11}]  }
   0x1   :  { %18 = vsyncpa [#allocation7], 0 }
   0x2   :  { %19 = vsyncpa [#allocation10], 0 }
   0x3   :  { %20 = vsyncpa [#allocation5], 0 }
   0x4   :  { %21 = vsyncpa [#allocation13], 0  ;;  %s1647_s17 = smov [#allocation6]   ;;  %s1648_s19 = smov [#allocation3]  }
   0x5   :  { %s43_s18 = sshll.u32 %s1647_s17, 4  ;;  %s29_s20 = sshll.u32 %s1648_s19, 4  ;;  %s44_s18 = int_to_ptr.vmem [resolvable:$true] %s43_s18  ;;  %s1719_s20 = int_to_ptr.vmem [resolvable:$true] %s29_s20 }
   0x6   :  { %s1483_s23 = scalar_lea.hbm %s2075_s3, 2048 }
   0x7   :  { %p1484_p0 = scmp.ne.s32.totalorder %s2075_s3, %s1483_s23  ;;  %p1487_p1 = scmp.lt.u32.totalorder %s1483_s23, %s2075_s3 }
   0x9   :  { %p1489_p2 = pnand %p1487_p1, %p1484_p0 }
   0xb   :  { %1492 = shalt.err (!%p1489_p2)
}
   0xc   :  { %s1493_s28 = scalar_lea.vmem %s44_s18, 2048  ;;  %p1498_p4 = scmp.lt.s32.totalorder %s44_s18, %s44_s18 }
   0xd   :  { %p1494_p3 = scmp.ne.s32.totalorder %s44_s18, %s1493_s28  ;;  %p1499_p5 = scmp.lt.s32.totalorder %s1493_s28, %s1493_s28 }
   0xf   :  { %p1500_p6 = por %p1499_p5, %p1498_p4 }
  0x11   :  { %p1501_p7 = pnand %p1500_p6, %p1494_p3 }
  0x13   :  { %1504 = shalt.err (!%p1501_p7)
}
  0x14   :  { %s1649_s29 = smov 128   ;;  %s1650_s30 = smov 8  }
  0x15   :  { %49 = dma.hbm_to_vmem [thread:$0]  %s2075_s3, 2048, %s44_s18, [#allocation7], %s1649_s29, %s1649_s29, %s1650_s30  }
  0x16   :  { %s1505_s16 = scalar_lea.hbm %s2073_s1, 2048 }
  0x17   :  { %p1506_p8 = scmp.ne.s32.totalorder %s2073_s1, %s1505_s16  ;;  %p1509_p9 = scmp.lt.u32.totalorder %s1505_s16, %s2073_s1 }
  0x19   :  { %p1511_p10 = pnand %p1509_p9, %p1506_p8 }
  0x1b   :  { %1514 = shalt.err (!%p1511_p10)
}
  0x1c   :  { %s1515_s23 = scalar_lea.vmem %s1719_s20, 2048  ;;  %p1520_p12 = scmp.lt.s32.totalorder %s1719_s20, %s1719_s20 }
  0x1d   :  { %p1516_p11 = scmp.ne.s32.totalorder %s1719_s20, %s1515_s23  ;;  %p1521_p13 = scmp.lt.s32.totalorder %s1515_s23, %s1515_s23 }
  0x1f   :  { %p1522_p0 = por %p1521_p13, %p1520_p12 }
  0x21   :  { %p1523_p1 = pnand %p1522_p0, %p1516_p11 }
  0x23   :  { %1526 = shalt.err (!%p1523_p1)
}
  0x24   :  { %35 = dma.hbm_to_vmem [thread:$0]  %s2073_s1, 2048, %s1719_s20, [#allocation4], %s1649_s29, %s1649_s29, %s1650_s30  }
  0x25   :  { %s1651_s24 = smov [#allocation8]   ;;  %s1652_s26 = smov [#allocation9]  }
  0x26   :  { %s57_s25 = sshll.u32 %s1651_s24, 4  ;;  %s69_s27 = sshll.u32 %s1652_s26, 4  ;;  %s58_s25 = int_to_ptr.vmem [resolvable:$true] %s57_s25  ;;  %s1756_s27 = int_to_ptr.vmem [resolvable:$true] %s69_s27 }
  0x27   :  { %s1527_s13 = scalar_lea.hbm %s2077_s5, 2048 }
  0x28   :  { %p1528_p2 = scmp.ne.s32.totalorder %s2077_s5, %s1527_s13  ;;  %p1531_p3 = scmp.lt.u32.totalorder %s1527_s13, %s2077_s5 }
  0x2a   :  { %p1533_p4 = pnand %p1531_p3, %p1528_p2 }
  0x2c   :  { %1536 = shalt.err (!%p1533_p4)
}
  0x2d   :  { %s1537_s1 = scalar_lea.vmem %s58_s25, 2048  ;;  %p1542_p6 = scmp.lt.s32.totalorder %s58_s25, %s58_s25 }
  0x2e   :  { %p1538_p5 = scmp.ne.s32.totalorder %s58_s25, %s1537_s1  ;;  %p1543_p7 = scmp.lt.s32.totalorder %s1537_s1, %s1537_s1 }
  0x30   :  { %p1544_p8 = por %p1543_p7, %p1542_p6 }
  0x32   :  { %p1545_p9 = pnand %p1544_p8, %p1538_p5 }
  0x34   :  { %1548 = shalt.err (!%p1545_p9)
}
  0x35   :  { %63 = dma.hbm_to_vmem [thread:$0]  %s2077_s5, 2048, %s58_s25, [#allocation7], %s1649_s29, %s1649_s29, %s1650_s30  }
  0x36   :  { %s1549_s23 = scalar_lea.hbm %s2078_s6, 2048 }
  0x37   :  { %p1550_p10 = scmp.ne.s32.totalorder %s2078_s6, %s1549_s23  ;;  %p1553_p11 = scmp.lt.u32.totalorder %s1549_s23, %s2078_s6 }
  0x39   :  { %p1555_p12 = pnand %p1553_p11, %p1550_p10 }
  0x3b   :  { %1558 = shalt.err (!%p1555_p12)
}
  0x3c   :  { %s1559_s28 = scalar_lea.vmem %s1756_s27, 2048  ;;  %p1564_p0 = scmp.lt.s32.totalorder %s1756_s27, %s1756_s27 }
  0x3d   :  { %p1560_p13 = scmp.ne.s32.totalorder %s1756_s27, %s1559_s28  ;;  %p1565_p1 = scmp.lt.s32.totalorder %s1559_s28, %s1559_s28 }
  0x3f   :  { %p1566_p2 = por %p1565_p1, %p1564_p0 }
  0x41   :  { %p1567_p3 = pnand %p1566_p2, %p1560_p13 }
  0x43   :  { %1570 = shalt.err (!%p1567_p3)
}
  0x44   :  { %75 = dma.hbm_to_vmem [thread:$0]  %s2078_s6, 2048, %s1756_s27, [#allocation10], %s1649_s29, %s1649_s29, %s1650_s30  }
  0x45   :  { %1637 = dma.done.wait [#allocation4], 2048  }
  0x46   :  { %1638 = vsyncadd [#allocation4], 4294965248 }
  0x47   :  { %1639 = dma.done.wait [#allocation7], 4096  }
  0x48   :  { %1640 = vsyncadd [#allocation7], 4294963200 }
  0x49   :  { %1641 = dma.done.wait [#allocation10], 2048  }
  0x4a   :  { %1642 = vsyncadd [#allocation10], 4294965248  ;;  %v1653_v0 = vmov 0.0|0.0   ;;  %vm1654_vm0 = vmmov 0   ;;  %v1655_v1 = vmov 0.0   ;;  %v113_v2 = vld [vmem:[#allocation3] sm:$0xff] }
  0x4b   :  { %1335 = vmatprep.subr.bf16.mxu0 %v1653_v0  ;;  %1201 = vmatprep.mubr.msk.f32.mxu0 %vm1654_vm0, %v1655_v1  ;;  %v114_v3 = vld [vmem:[#allocation3 + $0x8] sm:$0xff]  ;;  %v115_v4 = vld [vmem:[#allocation3 + $0x10] sm:$0xff]  ;;  %v116_v6 = vld [vmem:[#allocation3 + $0x18] sm:$0xff]  ;;  %vm658_vm3 = vcmask 64512  }
  0x4c   :  { %1359 = vmatprep.subr.bf16.mxu1 %v1653_v0  ;;  %1236 = vmatprep.mubr.msk.f32.mxu1 %vm1654_vm0, %v1655_v1  ;;  %v1336_v5 = vpack.c.bf16 %v114_v3, %v113_v2  ;;  %v1339_v7 = vpack.c.bf16 %v116_v6, %v115_v4  ;;  %v117_v8 = vld [vmem:[#allocation3 + $0x20] sm:$0xff]  ;;  %v118_v9 = vld [vmem:[#allocation3 + $0x28] sm:$0xff]  ;;  %v209_v12 = vld [vmem:[#allocation6 + $0x10] sm:$0xff] }
  0x4d   :  { %v207_v10 = vld [vmem:[#allocation6] sm:$0xff]  ;;  %v208_v11 = vld [vmem:[#allocation6 + $0x8] sm:$0xff]  ;;  %v210_v13 = vld [vmem:[#allocation6 + $0x18] sm:$0xff]  ;;  %v1342_v14 = vpack.c.bf16 %v118_v9, %v117_v8 }
  0x4e   :  { %1337 = vmatpush3.bf16.msra.mxu0 %v1336_v5  ;;  %v1360_v15 = vpack.c.bf16 %v208_v11, %v207_v10  ;;  %v119_v16 = vld [vmem:[#allocation3 + $0x30] sm:$0xff]  ;;  %v120_v17 = vld [vmem:[#allocation3 + $0x38] sm:$0xff]  ;;  %v1363_v18 = vpack.c.bf16 %v210_v13, %v209_v12  ;;  %v211_v19 = vld [vmem:[#allocation6 + $0x20] sm:$0xff] }
  0x4f   :  { %1338 = vmatprep.subr.bf16.mxu0 %v1653_v0  ;;  %v212_v20 = vld [vmem:[#allocation6 + $0x28] sm:$0xff]  ;;  %v1345_v21 = vpack.c.bf16 %v120_v17, %v119_v16  ;;  %v121_v22 = vld [vmem:[#allocation3 + $0x40] sm:$0xff]  ;;  %v213_v25 = vld [vmem:[#allocation6 + $0x30] sm:$0xff] }
  0x50   :  { %1361 = vmatpush3.bf16.msra.mxu1 %v1360_v15  ;;  %v122_v23 = vld [vmem:[#allocation3 + $0x48] sm:$0xff]  ;;  %v1366_v24 = vpack.c.bf16 %v212_v20, %v211_v19  ;;  %v214_v26 = vld [vmem:[#allocation6 + $0x38] sm:$0xff]  ;;  %v123_v28 = vld [vmem:[#allocation3 + $0x50] sm:$0xff] }
  0x51   :  { %1362 = vmatprep.subr.bf16.mxu1 %v1653_v0  ;;  %v1348_v27 = vpack.c.bf16 %v122_v23, %v121_v22  ;;  %v124_v29 = vld [vmem:[#allocation3 + $0x58] sm:$0xff]  ;;  %v1369_v30 = vpack.c.bf16 %v214_v26, %v213_v25  ;;  %v215_v31 = vld [vmem:[#allocation6 + $0x40] sm:$0xff]  ;;  %v216_v32 = vld [vmem:[#allocation6 + $0x48] sm:$0xff]  ;;  %v387_v22 = vlaneseq }
  0x52   :  { %1340 = vmatpush3.bf16.msra.mxu0 %v1339_v7  ;;  %v1351_v33 = vpack.c.bf16 %v124_v29, %v123_v28  ;;  %v125_v34 = vld [vmem:[#allocation3 + $0x60] sm:$0xff]  ;;  %v126_v35 = vld [vmem:[#allocation3 + $0x68] sm:$0xff]  ;;  %v1372_v36 = vpack.c.bf16 %v216_v32, %v215_v31  ;;  %v217_v37 = vld [vmem:[#allocation6 + $0x50] sm:$0xff] }
  0x53   :  { %1341 = vmatprep.subr.bf16.mxu0 %v1653_v0  ;;  %v218_v38 = vld [vmem:[#allocation6 + $0x58] sm:$0xff]  ;;  %v1354_v39 = vpack.c.bf16 %v126_v35, %v125_v34  ;;  %v127_v40 = vld [vmem:[#allocation3 + $0x70] sm:$0xff]  ;;  %v219_v43 = vld [vmem:[#allocation6 + $0x60] sm:$0xff]  ;;  %v388_v23 = vand.u32 127, %v387_v22 }
  0x54   :  { %1364 = vmatpush3.bf16.msra.mxu1 %v1363_v18  ;;  %v128_v41 = vld [vmem:[#allocation3 + $0x78] sm:$0xff]  ;;  %v1375_v42 = vpack.c.bf16 %v218_v38, %v217_v37  ;;  %v220_v44 = vld [vmem:[#allocation6 + $0x68] sm:$0xff]  ;;  %v1815_v47 = vld [vmem:[%s2072_s0] sm:$0xff] }
  0x55   :  { %1365 = vmatprep.subr.bf16.mxu1 %v1653_v0  ;;  %v1357_v45 = vpack.c.bf16 %v128_v41, %v127_v40  ;;  %v1378_v46 = vpack.c.bf16 %v220_v44, %v219_v43  ;;  %v221_v48 = vld [vmem:[#allocation6 + $0x70] sm:$0xff]  ;;  %v222_v49 = vld [vmem:[#allocation6 + $0x78] sm:$0xff]  ;;  %v300_v51 = vld [vmem:[#allocation8] sm:$0xff]  ;;  %vm389_vm1 = vcmp.lt.s32.totalorder %v388_v23, 64 }
  0x56   :  { %1343 = vmatpush3.bf16.msra.mxu0 %v1342_v14  ;;  %v1381_v50 = vpack.c.bf16 %v222_v49, %v221_v48  ;;  %v301_v52 = vld [vmem:[#allocation8 + $0x8] sm:$0xff]  ;;  %v302_v53 = vld [vmem:[#allocation8 + $0x10] sm:$0xff]  ;;  %v303_v55 = vld [vmem:[#allocation8 + $0x18] sm:$0xff] }
  0x57   :  { %1344 = vmatprep.subr.bf16.mxu0 %v1653_v0  ;;  %v1384_v54 = vpack.c.bf16 %v301_v52, %v300_v51  ;;  %v1387_v56 = vpack.c.bf16 %v303_v55, %v302_v53  ;;  %v304_v57 = vld [vmem:[#allocation8 + $0x20] sm:$0xff]  ;;  %v305_v58 = vld [vmem:[#allocation8 + $0x28] sm:$0xff]  ;;  %v306_v60 = vld [vmem:[#allocation8 + $0x30] sm:$0xff] }
  0x58   :  { %1367 = vmatpush3.bf16.msra.mxu1 %v1366_v24  ;;  %v1390_v59 = vpack.c.bf16 %v305_v58, %v304_v57  ;;  %v307_v61 = vld [vmem:[#allocation8 + $0x38] sm:$0xff]  ;;  %v308_v63 = vld [vmem:[#allocation8 + $0x40] sm:$0xff]  ;;  %v309_v2 = vld [vmem:[#allocation8 + $0x48] sm:$0xff] }
  0x59   :  { %1368 = vmatprep.subr.bf16.mxu1 %v1653_v0  ;;  %v1393_v62 = vpack.c.bf16 %v307_v61, %v306_v60  ;;  %v1396_v3 = vpack.c.bf16 %v309_v2, %v308_v63  ;;  %v310_v4 = vld [vmem:[#allocation8 + $0x50] sm:$0xff]  ;;  %v311_v5 = vld [vmem:[#allocation8 + $0x58] sm:$0xff]  ;;  %v312_v7 = vld [vmem:[#allocation8 + $0x60] sm:$0xff] }
  0x5a   :  { %1346 = vmatpush3.bf16.msra.mxu0 %v1345_v21  ;;  %v1399_v6 = vpack.c.bf16 %v311_v5, %v310_v4  ;;  %v313_v8 = vld [vmem:[#allocation8 + $0x68] sm:$0xff]  ;;  %v1029_v10 = vld [vmem:[%s2074_s2] ss:$0 sm:$0xff]  ;;  %v314_v15 = vld [vmem:[#allocation8 + $0x70] sm:$0xff] }
  0x5b   :  { %1347 = vmatprep.subr.bf16.mxu0 %v1653_v0  ;;  %v1402_v9 = vpack.c.bf16 %v313_v8, %v312_v7  ;;  %v315_v16 = vld [vmem:[#allocation8 + $0x78] sm:$0xff]  ;;  %v1030_v18 = vld [vmem:[%s2076_s4] ss:$0 sm:$0xff]  ;;  %v1840_v29 = vld [vmem:[#allocation9 + $0x8] sm:$0xff] }
  0x5c   :  { %1370 = vmatpush3.bf16.msra.mxu1 %v1369_v30  ;;  %v1405_v17 = vpack.c.bf16 %v315_v16, %v314_v15  ;;  %v1838_v28 = vld [vmem:[#allocation9] sm:$0xff]  ;;  %v1842_v30 = vld [vmem:[#allocation9 + $0x10] sm:$0xff]  ;;  %v1846_v32 = vld [vmem:[#allocation9 + $0x18] sm:$0xff] }
  0x5d   :  { %1371 = vmatprep.subr.bf16.mxu1 %v1653_v0  ;;  %v1408_v31 = vpack.c.bf16 %v1840_v29, %v1838_v28  ;;  %v1851_v34 = vld [vmem:[#allocation9 + $0x20] sm:$0xff]  ;;  %v1853_v35 = vld [vmem:[#allocation9 + $0x28] sm:$0xff]  ;;  %v1858_v37 = vld [vmem:[#allocation9 + $0x30] sm:$0xff] }
  0x5e   :  { %1349 = vmatpush3.bf16.msra.mxu0 %v1348_v27  ;;  %v1860_v38 = vld [vmem:[#allocation9 + $0x38] sm:$0xff]  ;;  %v1865_v40 = vld [vmem:[#allocation9 + $0x40] sm:$0xff]  ;;  %v1867_v41 = vld [vmem:[#allocation9 + $0x48] sm:$0xff] }
  0x5f   :  { %1350 = vmatprep.subr.bf16.mxu0 %v1653_v0  ;;  %v1873_v48 = vld [vmem:[#allocation9 + $0x50] sm:$0xff]  ;;  %v1875_v49 = vld [vmem:[#allocation9 + $0x58] sm:$0xff]  ;;  %v1880_v51 = vld [vmem:[#allocation9 + $0x60] sm:$0xff] }
  0x60   :  { %1373 = vmatpush3.bf16.msra.mxu1 %v1372_v36  ;;  %v1414_v36 = vpack.c.bf16 %v1853_v35, %v1851_v34  ;;  %v1882_v52 = vld [vmem:[#allocation9 + $0x68] sm:$0xff]  ;;  %v1888_v55 = vld [vmem:[#allocation9 + $0x78] sm:$0xff]  ;;  %v506_v57 = vld [vmem:[%s2079_s7 + $0x80] sm:$0xff] }
  0x61   :  { %1374 = vmatprep.subr.bf16.mxu1 %v1653_v0  ;;  %v1426_v53 = vpack.c.bf16 %v1882_v52, %v1880_v51  ;;  %v507_v58 = vld [vmem:[%s2079_s7 + $0x88] sm:$0xff]  ;;  %v508_v61 = vld [vmem:[%s2079_s7 + $0x90] sm:$0xff]  ;;  %v493_v7 = vld [vmem:[%s2079_s7 + $0x18] sm:$0xff] }
  0x62   :  { %1352 = vmatpush3.bf16.msra.mxu0 %v1351_v33  ;;  %v1411_v33 = vpack.c.bf16 %v1846_v32, %v1842_v30  ;;  %v1431_v60 = vpack.c.bf16 %v507_v58, %v506_v57  ;;  %v513_v15 = vld [vmem:[%s2079_s7 + $0xb8] sm:$0xff]  ;;  %v514_v22 = vld [vmem:[%s2079_s7 + $0xc0] sm:$0xff]  ;;  %v515_v23 = vld [vmem:[%s2079_s7 + $0xc8] sm:$0xff] }
  0x63   :  { %1353 = vmatprep.subr.bf16.mxu0 %v1653_v0  ;;  %v520_v57 = vld [vmem:[%s2079_s7 + $0xf0] sm:$0xff]  ;;  %v521_v58 = vld [vmem:[%s2079_s7 + $0xf8] sm:$0xff] }
  0x64   :  { %1376 = vmatpush3.bf16.msra.mxu1 %v1375_v42  ;;  %v1420_v42 = vpack.c.bf16 %v1867_v41, %v1865_v40 }
  0x65   :  { %1377 = vmatprep.subr.bf16.mxu1 %v1653_v0 }
  0x66   :  { %1355 = vmatpush3.bf16.msra.mxu0 %v1354_v39  ;;  %v1417_v39 = vpack.c.bf16 %v1860_v38, %v1858_v37 }
  0x67   :  { %1356 = vmatprep.subr.bf16.mxu0 %v1653_v0 }
  0x68   :  { %1379 = vmatpush3.bf16.msra.mxu1 %v1378_v46 }
  0x69   :  { %1380 = vmatprep.subr.bf16.mxu1 %v1653_v0 }
  0x6a   :  { %1358 = vmatpush3.bf16.msra.mxu0 %v1357_v45 }
  0x6b   :  { %1383 = vmatprep.subr.bf16.mxu0 %v1653_v0 }
  0x6c   :  { %1382 = vmatpush3.bf16.msra.mxu1 %v1381_v50  ;;  %v1423_v50 = vpack.c.bf16 %v1875_v49, %v1873_v48 }
  0x6d   :  { %1202 = vmatmul.mubr.f32.vlgmr.msra.gmra.mrb[0].mxu0 %v1815_v47  ;;  %1407 = vmatprep.subr.bf16.mxu1 %v1653_v0 }
  0x6e   :  { %1271 = vmatprep.mubr.msk.f32.mxu0 %vm1654_vm0, %v1655_v1  ;;  %1385 = vmatpush3.bf16.msra.mxu0 %v1384_v54  ;;  %v1886_v54 = vld [vmem:[#allocation9 + $0x70] sm:$0xff] }
  0x6f   :  { %1386 = vmatprep.subr.bf16.mxu0 %v1653_v0 }
  0x72   :  { %1388 = vmatpush3.bf16.msra.mxu0 %v1387_v56  ;;  %v1429_v56 = vpack.c.bf16 %v1888_v55, %v1886_v54 }
  0x73   :  { %1389 = vmatprep.subr.bf16.mxu0 %v1653_v0 }
  0x76   :  { %1391 = vmatpush3.bf16.msra.mxu0 %v1390_v59  ;;  %v490_v59 = vld [vmem:[%s2079_s7] sm:$0xff] }
  0x77   :  { %1392 = vmatprep.subr.bf16.mxu0 %v1653_v0 }
  0x7a   :  { %1394 = vmatpush3.bf16.msra.mxu0 %v1393_v62  ;;  %v509_v62 = vld [vmem:[%s2079_s7 + $0x98] sm:$0xff] }
  0x7b   :  { %1395 = vmatprep.subr.bf16.mxu0 %v1653_v0  ;;  %v1435_v2 = vpack.c.bf16 %v509_v62, %v508_v61 }
  0x7e   :  { %1397 = vmatpush3.bf16.msra.mxu0 %v1396_v3 }
  0x7f   :  { %1398 = vmatprep.subr.bf16.mxu0 %v1653_v0 }
  0x82   :  { %1400 = vmatpush3.bf16.msra.mxu0 %v1399_v6  ;;  %v492_v6 = vld [vmem:[%s2079_s7 + $0x10] sm:$0xff] }
  0x83   :  { %1401 = vmatprep.subr.bf16.mxu0 %v1653_v0  ;;  %v1437_v8 = vpack.c.bf16 %v493_v7, %v492_v6 }
  0x86   :  { %1403 = vmatpush3.bf16.msra.mxu0 %v1402_v9  ;;  %v510_v9 = vld [vmem:[%s2079_s7 + $0xa0] sm:$0xff] }
  0x87   :  { %1404 = vmatprep.subr.bf16.mxu0 %v1653_v0 }
  0x8a   :  { %1406 = vmatpush3.bf16.msra.mxu0 %v1405_v17 }
  0x8b   :  { %1432 = vmatprep.subr.bf16.mxu0 %v1431_v60  ;;  %v504_v60 = vld [vmem:[%s2079_s7 + $0x70] sm:$0xff] }
 0x140   :  { %v202_v11 = vpop.f32.mrb[0].mxu0 }
 0x141   :  { %v203_v12 = vadd.f32 %v1029_v10, %v202_v11  ;;  %v1203_v13 = vpop.f32.mrb[1].mxu0  ;;  %v511_v10 = vld [vmem:[%s2079_s7 + $0xa8] sm:$0xff] }
 0x142   :  { %v1439_v11 = vpack.c.bf16 %v511_v10, %v510_v9 }
 0x143   :  { %v206_v14 = vmax.f32 %v203_v12, 0.0  ;;  %v495_v12 = vld [vmem:[%s2079_s7 + $0x28] sm:$0xff] }
 0x145   :  { %1237 = vmatmul.mubr.f32.vlgmr.msra.gmra.mrb[0].mxu1 %v206_v14  ;;  %v512_v14 = vld [vmem:[%s2079_s7 + $0xb0] sm:$0xff] }
 0x146   :  { %1306 = vmatprep.mubr.msk.f32.mxu1 %vm1654_vm0, %v1655_v1  ;;  %1409 = vmatpush3.bf16.msra.mxu1 %v1408_v31  ;;  %v1443_v17 = vpack.c.bf16 %v513_v15, %v512_v14  ;;  %v516_v31 = vld [vmem:[%s2079_s7 + $0xd0] sm:$0xff] }
 0x147   :  { %1410 = vmatprep.subr.bf16.mxu1 %v1653_v0 }
 0x14a   :  { %1412 = vmatpush3.bf16.msra.mxu1 %v1411_v33  ;;  %v517_v33 = vld [vmem:[%s2079_s7 + $0xd8] sm:$0xff] }
 0x14b   :  { %1413 = vmatprep.subr.bf16.mxu1 %v1653_v0 }
 0x14e   :  { %1415 = vmatpush3.bf16.msra.mxu1 %v1414_v36  ;;  %v1451_v36 = vpack.c.bf16 %v517_v33, %v516_v31 }
 0x14f   :  { %1416 = vmatprep.subr.bf16.mxu1 %v1653_v0 }
 0x152   :  { %1418 = vmatpush3.bf16.msra.mxu1 %v1417_v39  ;;  %v500_v39 = vld [vmem:[%s2079_s7 + $0x50] sm:$0xff] }
 0x153   :  { %1419 = vmatprep.subr.bf16.mxu1 %v1653_v0 }
 0x156   :  { %1421 = vmatpush3.bf16.msra.mxu1 %v1420_v42  ;;  %v501_v42 = vld [vmem:[%s2079_s7 + $0x58] sm:$0xff] }
 0x157   :  { %1422 = vmatprep.subr.bf16.mxu1 %v1653_v0 }
 0x15a   :  { %1424 = vmatpush3.bf16.msra.mxu1 %v1423_v50  ;;  %v502_v50 = vld [vmem:[%s2079_s7 + $0x60] sm:$0xff] }
 0x15b   :  { %1425 = vmatprep.subr.bf16.mxu1 %v1653_v0 }
 0x15e   :  { %1427 = vmatpush3.bf16.msra.mxu1 %v1426_v53  ;;  %v503_v53 = vld [vmem:[%s2079_s7 + $0x68] sm:$0xff] }
 0x15f   :  { %1428 = vmatprep.subr.bf16.mxu1 %v1653_v0  ;;  %v491_v0 = vld [vmem:[%s2079_s7 + $0x8] sm:$0xff] }
 0x160   :  { %v1433_v63 = vpack.c.bf16 %v491_v0, %v490_v59  ;;  %v1459_v59 = vpack.c.bf16 %v521_v58, %v520_v57  ;;  %v505_v0 = vld [vmem:[%s2079_s7 + $0x78] sm:$0xff] }
 0x161   :  { %v1461_v61 = vpack.c.bf16 %v505_v0, %v504_v60 }
 0x162   :  { %1430 = vmatpush3.bf16.msra.mxu1 %v1429_v56  ;;  %v1457_v56 = vpack.c.bf16 %v503_v53, %v502_v50 }
 0x163   :  { %1309 = vmatprep.subr.mxu1 %v1815_v47 }
 0x218   :  { %v296_v19 = vpop.f32.mrb[0].mxu1 }
 0x219   :  { %v297_v20 = vadd.f32 %v1030_v18, %v296_v19  ;;  %v1238_v21 = vpop.f32.mrb[1].mxu1  ;;  %v496_v19 = vld [vmem:[%s2079_s7 + $0x30] sm:$0xff] }
 0x21b   :  { %1272 = vmatmul.mubr.f32.vlgmr.msra.gmra.mrb[2].mxu0 %v297_v20  ;;  %v497_v20 = vld [vmem:[%s2079_s7 + $0x38] sm:$0xff] }
 0x21c   :  { %1434 = vmatpush3.bf16.msra.mxu0 %v1433_v63  ;;  %v1445_v21 = vpack.c.bf16 %v497_v20, %v496_v19 }
 0x21d   :  { %1436 = vmatprep.subr.bf16.mxu0 %v1435_v2 }
 0x220   :  { %1438 = vmatpush3.bf16.msra.mxu0 %v1437_v8 }
 0x221   :  { %1440 = vmatprep.subr.bf16.mxu0 %v1439_v11 }
 0x2ee   :  { %v382_v24 = vpop.f32.mrb[2].mxu0 }
 0x2ef   :  { %v386_v25 = vmul.f32 0.088388346, %v382_v24  ;;  %v1273_v26 = vpop.f32.mrb[3].mxu0  ;;  %v1447_v24 = vpack.c.bf16 %v515_v23, %v514_v22 }
 0x2f0   :  { %v499_v26 = vld [vmem:[%s2079_s7 + $0x48] sm:$0xff] }
 0x2f1   :  { %v390_v27 = vsel %vm389_vm1, %v386_v25, -1e+30  ;;  %v498_v25 = vld [vmem:[%s2079_s7 + $0x40] sm:$0xff] }
 0x2f2   :  { %391 = vmax.xlane.f32.xlu0 %v390_v27 }
 0x37f   :  { %v392_v43 = vpop.xlane.xlu0 %391 }
 0x380   :  { %v393_v44 = vsub.f32 %v390_v27, %v392_v43  ;;  %v1449_v27 = vpack.c.bf16 %v499_v26, %v498_v25  ;;  %v1453_v43 = vpack.c.bf16 %v501_v42, %v500_v39 }
 0x382   :  { %v394_v45 = vmul.f32 1.442695, %v393_v44  ;;  %v518_v44 = vld [vmem:[%s2079_s7 + $0xe0] sm:$0xff] }
 0x384   :  { %1475 = vpow2.f32 %v394_v45  ;;  %v519_v45 = vld [vmem:[%s2079_s7 + $0xe8] sm:$0xff] }
 0x38e   :  { %v1476_v46 = vpop.eup %1475 }
 0x38f   :  { %396 = vadd.xlane.f32.xlu0 %v1476_v46 }
 0x41c   :  { %v397_v3 = vpop.xlane.xlu0 %396 }
 0x41d   :  { %v398_v4 = vmul.f32 0.1, %v397_v3  ;;  %1477 = vrcp.f32 %v397_v3 }
 0x41f   :  { %vm399_vm2 = vcmp.gt.f32.partialorder %v1476_v46, %v398_v4 }
 0x420   :  { %v1031_v5 = vsel %vm399_vm2, 1.0, %v1655_v1  ;;  %v494_v1 = vld [vmem:[%s2079_s7 + $0x20] sm:$0xff]  ;;  %s1656_s7 = smov [#allocation12]  }
 0x421   :  { %626 = vxpose.xlu1.b32.start.end [1/1] (short) %v1031_v5, 128  ;;  %v1441_v13 = vpack.c.bf16 %v495_v12, %v494_v1  ;;  %s999_s5 = sshll.u32 %s1656_s7, 4  ;;  %s1000_s5 = int_to_ptr.vmem [resolvable:$true] %s999_s5 }
 0x422   :  { %s1571_s25 = scalar_lea.vmem %s1000_s5, 128  ;;  %p1576_p5 = scmp.lt.s32.totalorder %s1000_s5, %s1000_s5 }
 0x423   :  { %1442 = vmatpush3.bf16.msra.mxu0 %v1441_v13  ;;  %p1572_p4 = scmp.ne.s32.totalorder %s1000_s5, %s1571_s25  ;;  %p1577_p6 = scmp.lt.s32.totalorder %s1571_s25, %s1571_s25 }
 0x424   :  { %1444 = vmatprep.subr.bf16.mxu0 %v1443_v17 }
 0x425   :  { %p1578_p7 = por %p1577_p6, %p1576_p5 }
 0x427   :  { %v1478_v16 = vpop.eup %1477  ;;  %1446 = vmatpush3.bf16.msra.mxu0 %v1445_v21  ;;  %p1579_p8 = pnand %p1578_p7, %p1572_p4 }
 0x428   :  { %v403_v18 = vmul.f32 %v1478_v16, %v1476_v46  ;;  %1448 = vmatprep.subr.bf16.mxu0 %v1447_v24  ;;  %v1455_v46 = vpack.c.bf16 %v519_v45, %v518_v44 }
 0x42a   :  { %1307 = vmatmul.mubr.f32.vlgmr.msra.gmra.mrb[2].mxu1 %v403_v18  ;;  %609 = vst [vmem:[#allocation12] sm:$0xff] %v403_v18 }
 0x42b   :  { %1310 = vmatpush3.msra.mxu1 %v1815_v47  ;;  %1450 = vmatpush3.bf16.msra.mxu0 %v1449_v27 }
 0x42c   :  { %1452 = vmatprep.subr.bf16.mxu0 %v1451_v36 }
 0x42f   :  { %1454 = vmatpush3.bf16.msra.mxu0 %v1453_v43 }
 0x430   :  { %1456 = vmatprep.subr.bf16.mxu0 %v1455_v46 }
 0x433   :  { %1458 = vmatpush3.bf16.msra.mxu0 %v1457_v56 }
 0x434   :  { %1460 = vmatprep.subr.bf16.mxu0 %v1459_v59 }
 0x437   :  { %1462 = vmatpush3.bf16.msra.mxu0 %v1461_v61 }
 0x4a1   :  { %v642_v62 = vpop.trf.xlu1 }
 0x4a2   :  { %1311 = vmatprep.mubr.msk.f32.mxu1 %vm658_vm3, %v642_v62 }
 0x4a5   :  { %v643_v63 = vpop.trf.xlu1 }
 0x4a6   :  { %1312 = vmatmul.mubr.msk.f32.vlgmr.msra.gmra.mrb[4].mxu1 %vm658_vm3, %v643_v63 }
 0x4a9   :  { %v644_v2 = vpop.trf.xlu1 }
 0x4aa   :  { %1314 = vmatprep.mubr.msk.f32.mxu1 %vm658_vm3, %v644_v2 }
 0x4ad   :  { %v645_v3 = vpop.trf.xlu1 }
 0x4ae   :  { %1315 = vmatmul.mubr.msk.f32.gmra.mrb[6].mxu1 %vm658_vm3, %v645_v3 }
 0x4b1   :  { %v646_v4 = vpop.trf.xlu1 }
 0x4b2   :  { %1317 = vmatprep.mubr.msk.f32.mxu1 %vm658_vm3, %v646_v4 }
 0x4b5   :  { %v647_v5 = vpop.trf.xlu1 }
 0x4b6   :  { %1318 = vmatmul.mubr.msk.f32.gmra.mrb[8].mxu1 %vm658_vm3, %v647_v5 }
 0x4b9   :  { %v648_v6 = vpop.trf.xlu1 }
 0x4ba   :  { %1320 = vmatprep.mubr.msk.f32.mxu1 %vm658_vm3, %v648_v6 }
 0x4bd   :  { %v649_v7 = vpop.trf.xlu1 }
 0x4be   :  { %1321 = vmatmul.mubr.msk.f32.gmra.mrb[10].mxu1 %vm658_vm3, %v649_v7 }
 0x4c1   :  { %v650_v8 = vpop.trf.xlu1 }
 0x4c2   :  { %1323 = vmatprep.mubr.msk.f32.mxu1 %vm658_vm3, %v650_v8 }
 0x4c5   :  { %v651_v9 = vpop.trf.xlu1 }
 0x4c6   :  { %1324 = vmatmul.mubr.msk.f32.gmra.mrb[12].mxu1 %vm658_vm3, %v651_v9 }
 0x4c9   :  { %v652_v10 = vpop.trf.xlu1 }
 0x4ca   :  { %1326 = vmatprep.mubr.msk.f32.mxu1 %vm658_vm3, %v652_v10 }
 0x4cd   :  { %v653_v11 = vpop.trf.xlu1 }
 0x4ce   :  { %1327 = vmatmul.mubr.msk.f32.gmra.mrb[14].mxu1 %vm658_vm3, %v653_v11 }
 0x4d1   :  { %v654_v1 = vpop.trf.xlu1 }
 0x4d2   :  { %1329 = vmatprep.mubr.msk.f32.mxu1 %vm658_vm3, %v654_v1 }
 0x4d5   :  { %v655_v12 = vpop.trf.xlu1 }
 0x4d6   :  { %1330 = vmatmul.mubr.msk.f32.gmra.mrb[16].mxu1 %vm658_vm3, %v655_v12 }
 0x4d9   :  { %v656_v13 = vpop.trf.xlu1 }
 0x4da   :  { %1332 = vmatprep.mubr.msk.f32.mxu1 %vm658_vm3, %v656_v13 }
 0x4dd   :  { %v657_v14 = vpop.trf.xlu1 }
 0x4de   :  { %1333 = vmatmul.mubr.msk.f32.gmra.mrb[18].mxu1 %vm658_vm3, %v657_v14 }
 0x4fd   :  { %v2008_v15 = vpop.f32.mrb[2].mxu1 }
 0x4fe   :  { %v1308_v16 = vpop.f32.mrb[3].mxu1  ;;  %593 = vmatprep.mubr.f32.mxu0 %v2008_v15 }
 0x4ff   :  { %594 = vmatmul.mubr.f32.vlgmr.msra.gmra.mrb[4].mxu0 %v1815_v47 }
 0x500   :  { %1582 = shalt.err (!%p1579_p8)
}
 0x501   :  { %s1583_s0 = scalar_lea.hbm %s2082_s10, 128 }
 0x502   :  { %p1584_p9 = scmp.ne.s32.totalorder %s2082_s10, %s1583_s0  ;;  %p1587_p10 = scmp.lt.u32.totalorder %s1583_s0, %s2082_s10 }
 0x504   :  { %p1589_p11 = pnand %p1587_p10, %p1584_p9 }
 0x506   :  { %1592 = shalt.err (!%p1589_p11)
}
 0x507   :  { %1002 = dma.vmem_to_hbm [thread:$0]  %s1000_s5, 128, %s2082_s10, [#allocation13]   ;;  %v904_v17 = vmul.f32 0.99, %v1840_v29  ;;  %v903_v19 = vmul.f32 0.99, %v1838_v28 }
 0x508   :  { %v906_v25 = vmul.f32 0.99, %v1846_v32  ;;  %v905_v27 = vmul.f32 0.99, %v1842_v30  ;;  %v908_v28 = vmul.f32 0.99, %v1853_v35 }
 0x509   :  { %v907_v43 = vmul.f32 0.99, %v1851_v34  ;;  %v910_v30 = vmul.f32 0.99, %v1860_v38  ;;  %v909_v56 = vmul.f32 0.99, %v1858_v37 }
 0x50a   :  { %v912_v34 = vmul.f32 0.99, %v1867_v41  ;;  %v911_v61 = vmul.f32 0.99, %v1865_v40  ;;  %v914_v37 = vmul.f32 0.99, %v1875_v49 }
 0x50b   :  { %v913_v5 = vmul.f32 0.99, %v1873_v48  ;;  %v916_v40 = vmul.f32 0.99, %v1882_v52  ;;  %v915_v11 = vmul.f32 0.99, %v1880_v51 }
 0x50c   :  { %v918_v48 = vmul.f32 0.99, %v1888_v55  ;;  %s1657_s10 = smov [#allocation14]  }
 0x50d   :  { %s1008_s16 = sshll.u32 %s1657_s10, 4  ;;  %s1009_s16 = int_to_ptr.vmem [resolvable:$true] %s1008_s16 }
 0x50e   :  { %s1593_s17 = scalar_lea.vmem %s1009_s16, 2048  ;;  %p1598_p13 = scmp.lt.s32.totalorder %s1009_s16, %s1009_s16 }
 0x50f   :  { %p1594_p12 = scmp.ne.s32.totalorder %s1009_s16, %s1593_s17  ;;  %p1599_p0 = scmp.lt.s32.totalorder %s1593_s17, %s1593_s17 }
 0x511   :  { %p1600_p1 = por %p1599_p0, %p1598_p13 }
 0x513   :  { %p1601_p2 = pnand %p1600_p1, %p1594_p12 }
 0x579   :  { %v1313_v18 = vpop.f32.mrb[4].mxu1 }
 0x57a   :  { %v936_v20 = vmul.f32 0.01, %v1313_v18  ;;  %v773_v21 = vpop.f32.mrb[5].mxu1 }
 0x57b   :  { %v935_v22 = vmul.f32 0.01, %v773_v21 }
 0x57c   :  { %v952_v23 = vadd.f32 %v936_v20, %v904_v17  ;;  %v917_v17 = vmul.f32 0.99, %v1886_v54 }
 0x57d   :  { %v951_v24 = vadd.f32 %v935_v22, %v903_v19 }
 0x57e   :  { %968 = vst [vmem:[#allocation14 + $0x8] sm:$0xff] %v952_v23 }
 0x57f   :  { %967 = vst [vmem:[#allocation14] sm:$0xff] %v951_v24 }
 0x581   :  { %v1316_v26 = vpop.f32.mrb[6].mxu1 }
 0x582   :  { %v938_v31 = vmul.f32 0.01, %v1316_v26  ;;  %v783_v33 = vpop.f32.mrb[7].mxu1 }
 0x583   :  { %v937_v36 = vmul.f32 0.01, %v783_v33 }
 0x584   :  { %v954_v39 = vadd.f32 %v938_v31, %v906_v25 }
 0x585   :  { %v953_v29 = vadd.f32 %v937_v36, %v905_v27 }
 0x586   :  { %970 = vst [vmem:[#allocation14 + $0x18] sm:$0xff] %v954_v39 }
 0x587   :  { %969 = vst [vmem:[#allocation14 + $0x10] sm:$0xff] %v953_v29 }
 0x589   :  { %v1319_v42 = vpop.f32.mrb[8].mxu1 }
 0x58a   :  { %v940_v44 = vmul.f32 0.01, %v1319_v42  ;;  %v793_v45 = vpop.f32.mrb[9].mxu1 }
 0x58b   :  { %v939_v46 = vmul.f32 0.01, %v793_v45 }
 0x58c   :  { %v956_v50 = vadd.f32 %v940_v44, %v908_v28 }
 0x58d   :  { %v955_v32 = vadd.f32 %v939_v46, %v907_v43 }
 0x58e   :  { %972 = vst [vmem:[#allocation14 + $0x28] sm:$0xff] %v956_v50 }
 0x58f   :  { %971 = vst [vmem:[#allocation14 + $0x20] sm:$0xff] %v955_v32 }
 0x591   :  { %v1322_v53 = vpop.f32.mrb[10].mxu1 }
 0x592   :  { %v942_v57 = vmul.f32 0.01, %v1322_v53  ;;  %v803_v58 = vpop.f32.mrb[11].mxu1 }
 0x593   :  { %v941_v59 = vmul.f32 0.01, %v803_v58 }
 0x594   :  { %v958_v60 = vadd.f32 %v942_v57, %v910_v30 }
 0x595   :  { %v957_v35 = vadd.f32 %v941_v59, %v909_v56 }
 0x596   :  { %974 = vst [vmem:[#allocation14 + $0x38] sm:$0xff] %v958_v60 }
 0x597   :  { %973 = vst [vmem:[#allocation14 + $0x30] sm:$0xff] %v957_v35 }
 0x599   :  { %v1325_v0 = vpop.f32.mrb[12].mxu1 }
 0x59a   :  { %v944_v62 = vmul.f32 0.01, %v1325_v0  ;;  %v813_v63 = vpop.f32.mrb[13].mxu1 }
 0x59b   :  { %v943_v2 = vmul.f32 0.01, %v813_v63 }
 0x59c   :  { %v960_v3 = vadd.f32 %v944_v62, %v912_v34 }
 0x59d   :  { %v959_v38 = vadd.f32 %v943_v2, %v911_v61 }
 0x59e   :  { %976 = vst [vmem:[#allocation14 + $0x48] sm:$0xff] %v960_v3 }
 0x59f   :  { %975 = vst [vmem:[#allocation14 + $0x40] sm:$0xff] %v959_v38 }
 0x5a1   :  { %v1328_v4 = vpop.f32.mrb[14].mxu1 }
 0x5a2   :  { %v946_v6 = vmul.f32 0.01, %v1328_v4  ;;  %v823_v7 = vpop.f32.mrb[15].mxu1 }
 0x5a3   :  { %v945_v8 = vmul.f32 0.01, %v823_v7 }
 0x5a4   :  { %v962_v9 = vadd.f32 %v946_v6, %v914_v37 }
 0x5a5   :  { %v961_v41 = vadd.f32 %v945_v8, %v913_v5 }
 0x5a6   :  { %978 = vst [vmem:[#allocation14 + $0x58] sm:$0xff] %v962_v9 }
 0x5a7   :  { %977 = vst [vmem:[#allocation14 + $0x50] sm:$0xff] %v961_v41 }
 0x5a9   :  { %v1331_v10 = vpop.f32.mrb[16].mxu1 }
 0x5aa   :  { %v948_v1 = vmul.f32 0.01, %v1331_v10  ;;  %v833_v12 = vpop.f32.mrb[17].mxu1 }
 0x5ab   :  { %v947_v13 = vmul.f32 0.01, %v833_v12 }
 0x5ac   :  { %v964_v14 = vadd.f32 %v948_v1, %v916_v40 }
 0x5ad   :  { %v963_v49 = vadd.f32 %v947_v13, %v915_v11 }
 0x5ae   :  { %980 = vst [vmem:[#allocation14 + $0x68] sm:$0xff] %v964_v14 }
 0x5af   :  { %979 = vst [vmem:[#allocation14 + $0x60] sm:$0xff] %v963_v49 }
 0x5b1   :  { %v1334_v16 = vpop.f32.mrb[18].mxu1 }
 0x5b2   :  { %v950_v18 = vmul.f32 0.01, %v1334_v16  ;;  %v843_v19 = vpop.f32.mrb[19].mxu1 }
 0x5b3   :  { %v949_v52 = vmul.f32 0.01, %v843_v19 }
 0x5b4   :  { %v966_v20 = vadd.f32 %v950_v18, %v918_v48 }
 0x5b5   :  { %v965_v21 = vadd.f32 %v949_v52, %v917_v17 }
 0x5b6   :  { %982 = vst [vmem:[#allocation14 + $0x78] sm:$0xff] %v966_v20 }
 0x5b7   :  { %981 = vst [vmem:[#allocation14 + $0x70] sm:$0xff] %v965_v21 }
 0x5b8   :  { %1604 = shalt.err (!%p1601_p2)
}
 0x5b9   :  { %s1605_s19 = scalar_lea.hbm %s2083_s11, 2048 }
 0x5ba   :  { %p1606_p3 = scmp.ne.s32.totalorder %s2083_s11, %s1605_s19  ;;  %p1609_p4 = scmp.lt.u32.totalorder %s1605_s19, %s2083_s11 }
 0x5bc   :  { %p1611_p5 = pnand %p1609_p4, %p1606_p3 }
 0x5be   :  { %1614 = shalt.err (!%p1611_p5)
}
 0x5bf   :  { %1014 = dma.vmem_to_hbm [thread:$0]  %s1009_s16, 2048, %s2083_s11, [#allocation13], %s1649_s29, %s1649_s29, %s1650_s30  }
 0x5c0   :  { %v1032_v54 = vld [vmem:[%s2080_s8] ss:$0 sm:$0xff]  ;;  %s1658_s7 = smov [#allocation11]  }
 0x5c1   :  { %s989_s11 = sshll.u32 %s1658_s7, 4  ;;  %s990_s11 = int_to_ptr.vmem [resolvable:$true] %s989_s11 }
 0x5c2   :  { %s1615_s8 = scalar_lea.vmem %s990_s11, 128  ;;  %p1620_p7 = scmp.lt.s32.totalorder %s990_s11, %s990_s11 }
 0x5c3   :  { %p1616_p6 = scmp.ne.s32.totalorder %s990_s11, %s1615_s8  ;;  %p1621_p8 = scmp.lt.s32.totalorder %s1615_s8, %s1615_s8 }
 0x5c5   :  { %p1622_p9 = por %p1621_p8, %p1620_p7 }
 0x5c7   :  { %p1623_p10 = pnand %p1622_p9, %p1616_p6 }
 0x5d2   :  { %v1149_v51 = vpop.f32.mrb[4].mxu0 }
 0x5d3   :  { %v1150_v55 = vpop.f32.mrb[5].mxu0 }
 0x5d4   :  { %v1151_v22 = vadd.f32 %v1150_v55, %v1149_v51 }
 0x5d6   :  { %v596_v23 = vadd.f32 %v1151_v22, %v1032_v54 }
 0x5d8   :  { %v599_v24 = vsub.f32 0.0, %v596_v23 }
 0x5da   :  { %v600_v25 = vmul.f32 1.442695, %v599_v24 }
 0x5dc   :  { %1479 = vpow2.f32 %v600_v25 }
 0x5e6   :  { %v1480_v26 = vpop.eup %1479 }
 0x5e7   :  { %v602_v27 = vadd.f32 1.0, %v1480_v26 }
 0x5e9   :  { %1481 = vrcp.f32 %v602_v27 }
 0x5f3   :  { %v1482_v31 = vpop.eup %1481 }
 0x5f4   :  { %v604_v33 = vmul.f32 %v1482_v31, %v2008_v15  ;;  %v605_v36 = vsub.f32 1.0, %v1482_v31 }
 0x5f6   :  { %v606_v39 = vmul.f32 %v605_v36, %v1815_v47 }
 0x5f8   :  { %v607_v29 = vadd.f32 %v606_v39, %v604_v33 }
 0x5fa   :  { %608 = vst [vmem:[#allocation11] sm:$0xff] %v607_v29 }
 0x5fb   :  { %1626 = shalt.err (!%p1623_p10)
}
 0x5fc   :  { %s1627_s5 = scalar_lea.hbm %s2081_s9, 128 }
 0x5fd   :  { %p1628_p11 = scmp.ne.s32.totalorder %s2081_s9, %s1627_s5  ;;  %p1631_p12 = scmp.lt.u32.totalorder %s1627_s5, %s2081_s9 }
 0x5ff   :  { %p1633_p13 = pnand %p1631_p12, %p1628_p11 }
 0x601   :  { %1636 = shalt.err (!%p1633_p13)
}
 0x602   :  { %992 = dma.vmem_to_hbm [thread:$0]  %s990_s11, 128, %s2081_s9, [#allocation5]  }
 0x603   :  { %1643 = dma.done.wait [#allocation5], 128  }
 0x604   :  { %1644 = vsyncadd [#allocation5], 4294967168 }
 0x605   :  { %1645 = dma.done.wait [#allocation13], 2176  }
 0x606   :  { %1646 = vsyncadd [#allocation13], 4294965120 }
 0x607   :  { %1024 = vsyncpa [#allocation4], 1 }
 0x608   :  { %1025 = vsyncpa [#allocation7], 1 }
 0x609   :  { %1026 = vsyncpa [#allocation10], 1 }
 0x60a   :  { %1027 = vsyncpa [#allocation5], 1 }
 0x60b   :  { %1028 = vsyncpa [#allocation13], 1 }

</bundles_post_ra>
